<compile_context>
chip_gen: v6e
topology: v6e:2x2x1
jax: 0.10.0
libtpu: 0.0.40
codegen_flags: <defaults>
</compile_context>

<pallas_src>
import functools

import jax
import jax.numpy as jnp
from jax.experimental import pallas as pl
from jax.experimental.pallas import tpu as pltpu


def _clamp_kernel(x_ref, o_ref, *, vmin, vmax):
    # Static Python-float bounds -> weakly-typed scalars, result stays in the
    # label's dtype.  Two VPU min/max per element; compute is nowhere near a
    # bottleneck, this kernel is pure HBM streaming.
    o_ref[...] = jnp.minimum(jnp.maximum(x_ref[...], vmin), vmax)


_SUBLANE_MULT = {4: 8, 2: 16, 1: 32}     # packed sublane multiple per itemsize
_MIN_PALLAS_BYTES = 2 * 1024 * 1024      # below this the fused XLA clip wins
_MIN_GRID = 4                            # keep both v7x TCs fed & pipelined


def _clip_xla(x, vmin, vmax):
    """Fused XLA fallback (small / ragged / non-float labels)."""
    out = jnp.clip(x, vmin, vmax)
    return out if out.dtype == x.dtype else out.astype(x.dtype)


def _pick_lane_width(n, sub_mult):
    """Widest lane dim (multiple of 128) giving a copy-free, aligned reshape."""
    for c in (4096, 2048, 1024, 512, 256, 128):
        if n % c == 0 and (n // c) % sub_mult == 0:
            return c
    return None


def _block_params():
    """Per-generation (target_block_bytes, vmem_limit_bytes)."""
    try:
        vmem_cap = int(pltpu.get_tpu_info().vmem_capacity_bytes)
    except Exception:
        vmem_cap = 64 * 1024 * 1024           # conservative: assume v7x-sized
    if vmem_cap >= 96 * 1024 * 1024:          # v5e / v6e: 128 MiB physical VMEM
        return 8 << 20, 64 << 20
    return 4 << 20, 32 << 20                  # v7x: 64 MiB physical VMEM


def _pick_block_rows(rows, lanes, itemsize, sub_mult, target_bytes):
    """Rows per block: <= target_bytes, a multiple of sub_mult, at least
    _MIN_GRID blocks when possible, and (preferably) an exact divisor of
    `rows` so every block is full / lane-dense and the TC split is even."""
    tr = (target_bytes // (lanes * itemsize)) // sub_mult * sub_mult
    tr = max(sub_mult, tr)
    if rows >= _MIN_GRID * sub_mult:
        cap = (rows // _MIN_GRID) // sub_mult * sub_mult
        tr = max(sub_mult, min(tr, cap))
    tr = min(tr, rows)
    # Prefer an exact divisor; only search down to ~tr//2 so a pathological
    # row count can't shrink blocks to nothing (a ragged last block is still
    # correct, just masked).
    lo = max(sub_mult, (tr // 2 // sub_mult) * sub_mult)
    cand = tr
    while cand >= lo:
        if rows % cand == 0:
            return cand
        cand -= sub_mult
    return tr


def clamp_pallas(x, vmin=0.0, vmax=500.0, *, in_place=False):
    """Elementwise clamp of `x` to [vmin, vmax] via a Pallas TPU kernel."""
    orig_shape = x.shape
    dtype = x.dtype
    itemsize = jnp.dtype(dtype).itemsize
    n = int(x.size)

    # Small labels, non-float dtypes, or ragged sizes: the fused XLA clip is
    # the faster (and dtype-safe) path.  The Pallas kernel only ever runs on
    # the copy-free, aligned slab.
    if (n == 0
            or n * itemsize < _MIN_PALLAS_BYTES
            or not jnp.issubdtype(dtype, jnp.floating)):
        return _clip_xla(x, vmin, vmax)

    sub_mult = _SUBLANE_MULT.get(itemsize, 8)
    lanes = _pick_lane_width(n, sub_mult)
    if lanes is None:
        return _clip_xla(x, vmin, vmax)

    rows = n // lanes
    slab = x.reshape(rows, lanes)

    target_block_bytes, vmem_limit = _block_params()
    tr = _pick_block_rows(rows, lanes, itemsize, sub_mult, target_block_bytes)
    grid = (pl.cdiv(rows, tr),)

    kernel = functools.partial(_clamp_kernel, vmin=float(vmin), vmax=float(vmax))

    out = pl.pallas_call(
        kernel,
        out_shape=jax.ShapeDtypeStruct((rows, lanes), dtype),
        grid_spec=pltpu.PrefetchScalarGridSpec(
            num_scalar_prefetch=0,
            grid=grid,
            in_specs=[pl.BlockSpec((tr, lanes), lambda i: (i, 0))],
            out_specs=pl.BlockSpec((tr, lanes), lambda i: (i, 0)),
        ),
        compiler_params=pltpu.CompilerParams(
            dimension_semantics=("parallel",),     # shards blocks across v7x's 2 TCs
            vmem_limit_bytes=vmem_limit,
        ),
        # Output reuses the label slab's HBM buffer when it is donatable
        # (e.g. a jit intermediate); XLA copy-protects otherwise.
        input_output_aliases=({0: 0} if in_place else {}),
    )(slab)

    return out.reshape(orig_shape)


class ClampAGBM:
    """JAX/Pallas port of the PyTorch ClampAGBM transform."""

    def __init__(self, vmin=0.0, vmax=500.0, in_place=True):
        self.vmin = vmin
        self.vmax = vmax
        self.in_place = in_place

    def __call__(self, inputs):
        inputs = dict(inputs)  # shallow copy; mirrors PyTorch's in-place dict update
        inputs["label"] = clamp_pallas(inputs["label"], self.vmin, self.vmax,
                                       in_place=self.in_place)
        return inputs


if __name__ == "__main__":
    key = jax.random.PRNGKey(0)
    k1, k2, k3, k4, k5 = jax.random.split(key, 5)

    transform = ClampAGBM(vmin=0.0, vmax=500.0)

    # 1) Module-style small demo (batch=2, 1-channel AGBM label, 16x16 spatial).
    #    Small label takes the fused jnp.clip fast path.
    label_small = jax.random.uniform(k1, (2, 1, 16, 16), jnp.float32,
                                     minval=-100.0, maxval=700.0)
    image = jax.random.normal(k2, (2, 4, 16, 16), jnp.float32)
    out = transform({"image": image, "label": label_small})
    jax.block_until_ready(out["label"])
    assert out["label"].shape == label_small.shape
    assert out["label"].dtype == label_small.dtype
    assert jnp.allclose(out["label"], jnp.clip(label_small, 0.0, 500.0))
    assert jnp.array_equal(out["image"], image)

    # 2) 2 MiB label through the transform: Pallas path (copy-free wide-lane
    #    slab, >=4-block parallel grid, output aliased to the input slab).
    label_big = jax.random.uniform(k3, (2, 1, 512, 512), jnp.float32,
                                   minval=-100.0, maxval=700.0)
    ref_big = jnp.clip(label_big, 0.0, 500.0)
    out_big = transform({"image": image, "label": label_big})["label"]
    jax.block_until_ready(out_big)
    assert out_big.shape == label_big.shape and out_big.dtype == label_big.dtype
    assert jnp.allclose(out_big, ref_big)

    # 3) 4 MiB label: multi-block streaming with per-generation block sizing.
    label_multi = jax.random.uniform(k4, (1, 1, 1024, 1024), jnp.float32,
                                     minval=-100.0, maxval=700.0)
    out_multi = clamp_pallas(label_multi, 0.0, 500.0)
    jax.block_until_ready(out_multi)
    assert out_multi.shape == label_multi.shape and out_multi.dtype == label_multi.dtype
    assert jnp.allclose(out_multi, jnp.clip(label_multi, 0.0, 500.0))

    # 4) Ragged size: padded Pallas path was removed -> fused XLA clip fallback.
    label_ragged = jax.random.uniform(k5, (1, 1, 173, 131), jnp.float32,
                                      minval=-100.0, maxval=700.0)
    out_ragged = clamp_pallas(label_ragged, 0.0, 500.0)
    jax.block_until_ready(out_ragged)
    assert out_ragged.shape == label_ragged.shape
    assert jnp.allclose(out_ragged, jnp.clip(label_ragged, 0.0, 500.0))

    print("KERNEL_OK")
</pallas_src>

<mosaic_0001>
module attributes {stable_mosaic.version = 11 : i64} {
  func.func @_clamp_kernel(%arg0: i32, %arg1: memref<32x4096xf32, #tpu.memory_space<vmem>>, %arg2: memref<32x4096xf32, #tpu.memory_space<vmem>>) attributes {dimension_semantics = [#tpu.dimension_semantics<parallel>], iteration_bounds = array<i64: 4>, scalar_prefetch = 0 : i64, scratch_operands = 0 : i64, tpu.core_type = #tpu.core_type<tc>, window_params = [{transform_indices = @transform_0, window_bounds = array<i64: 32, 4096>}, {transform_indices = @transform_1, window_bounds = array<i64: 32, 4096>}]} {
    %c0 = arith.constant 0 : index
    %c0_0 = arith.constant 0 : index
    %0 = vector.load %arg1[%c0, %c0_0] : memref<32x4096xf32, #tpu.memory_space<vmem>>, vector<32x4096xf32>
    %cst = arith.constant 0.000000e+00 : f32
    %1 = vector.broadcast %cst : f32 to vector<32x4096xf32>
    %2 = arith.maximumf %0, %1 : vector<32x4096xf32>
    %cst_1 = arith.constant 5.000000e+02 : f32
    %3 = vector.broadcast %cst_1 : f32 to vector<32x4096xf32>
    %4 = arith.minimumf %2, %3 : vector<32x4096xf32>
    %c0_2 = arith.constant 0 : index
    %c0_3 = arith.constant 0 : index
    %5 = vector.load %arg2[%c0_2, %c0_3] : memref<32x4096xf32, #tpu.memory_space<vmem>>, vector<32x4096xf32>
    tpu.vector_store %arg2[%c0_2, %c0_3], %4 {strides = array<i32>} : memref<32x4096xf32, #tpu.memory_space<vmem>>, vector<32x4096xf32>,
    return
  }
  func.func @transform_0(%arg0: i32) -> (i32, i32) {
    %c0_i32 = arith.constant 0 : i32
    %c0_i32_0 = arith.constant 0 : i32
    return %arg0, %c0_i32 : i32, i32
  }
  func.func @transform_1(%arg0: i32) -> (i32, i32) {
    %c0_i32 = arith.constant 0 : i32
    %c0_i32_0 = arith.constant 0 : i32
    return %arg0, %c0_i32 : i32, i32
  }
}

</mosaic_0001>

<bundles_post_ra>
// kernel: tpu_custom_call.1
= control target key start
LH: loop header
LB: loop body
LE: loop exit
PB: predicated region body
PF: predicated region fallthrough
CT: control target
= control target key end

     0   :  { %6 = vsyncpa [#allocation3], 0  ;;  %s1337_s0 = inlined_call_operand.hbm [shape: f32[128,4096], index: 0, kind: input, shape index: {}, may-alias: {0,1}]   ;;  %s1338_s1 = inlined_call_operand.hbm [shape: f32[128,4096], index: 1, kind: output, shape index: {}, may-alias: {0,1}]  }
   0x1   :  { %8 = vsyncpa [#allocation3 + $0x1], 0 }
   0x2   :  { %9 = vsyncpa [#allocation4], 0 }
   0x3   :  { %11 = vsyncpa [#allocation4 + $0x1], 0  ;;  %s918_s6 = smov 0   ;;  %s920_s7 = smov 0  }
   0x4   :  { %s922_s8 = smov 0   ;;  %s924_s9 = smov 0  }
   0x5 LB: > { %s939_s10 = sadd.s32 4294967295, %s900_s9   ;;  %s738_s11 = sadd.s32 4294967294, %s900_s9   ;;  %s900_s9 = sphi %s924_s9, %s1352_s9   ;;  %s896_s8 = sphi %s922_s8, %s1351_s8   ;;  %s892_s7 = sphi %s920_s7, %s1350_s7   ;;  %s888_s6 = sphi %s918_s6, %s1349_s6  }
   0x6   : > { %s943_s12 = sadd.s32 1, %s900_s9   ;;  %s24_s13 = sadd.s32 1, %s896_s8 }
   0x7   : > { %s21_s14 = ssub.s32 %s900_s9, %s943_s12  ;;  %p31_p0 = scmp.ne.s32.totalorder %s896_s8, %s892_s7 }
   0x8   : > { %p22_p1 = scmp.eq.s32.totalorder %s21_s14, 0  ;;  %p32_p2 = scmp.eq.s32.totalorder %s900_s9, 0 }
   0x9   : > { %p37_p3 = scmp.ne.s32.totalorder %s892_s7, %s888_s6  ;;  %p38_p4 = scmp.eq.s32.totalorder %s939_s10, 0 }
   0xa   : > { %s955_s15 = scalar_select %p22_p1, %s896_s8, %s24_s13  }
   0xb   : > { %p957_p5 = por %p32_p2, %p31_p0  ;;  %p961_p6 = por %p38_p4, %p37_p3 }
   0xc   : > { %p61_p7 = scmp.eq.s32.totalorder %s939_s10, 3  ;;  %p67_p8 = scmp.eq.s32.totalorder %s738_s11, 3 }
   0xd   : > { %s1342_s17 = scalar_select %p961_p6, 1, 0 }
   0xe   : > { %p770_p9 = scmp.lt.s32.totalorder %s900_s9, 4  ;;  %p967_p10 = por %p61_p7, %p31_p0 }
   0xf   : > { %p971_p11 = por %p67_p8, %p37_p3  ;;  %s87_s20 = sand.u32 1, %s896_s8  }
  0x10   : > { %s1343_s18 = scalar_select %p967_p10, 1, 0 }
  0x11   : > { %s1344_s19 = scalar_select %p971_p11, 1, 0 }
  0x12   : > { %s755_s21 = sshll.u32 %s900_s9, 14  ;;  %s741_s22 = sshll.u32 %s87_s20, 10 }
  0x13   : > { %s980_s25 = scalar_lea.hbm %s1337_s0, %s755_s21  ;;  %s91_s26 = scalar_lea.vmem [#allocation2], %s741_s22 }
  0x14   : > { %s99_s27 = sshll.u32 %s91_s26, 4  ;;  %p984_p12 = pnand %p770_p9, %p957_p5  ;;  %s988_s27 = int_to_ptr.vmem [resolvable:$true] %s99_s27 }
  0x15   : > { %s990_s29 = scalar_lea.sflag [#allocation3], %s87_s20  ;;  %s808_s30 = scalar_lea.hbm %s980_s25, 16384 }
  0x16   : > { %p809_p13 = scmp.ne.s32.totalorder %s980_s25, %s808_s30  ;;  %p810_p0 = pneg %p984_p12 }
  0x17   : > { %s813_s4 = scalar_lea.hbm %s1337_s0, 65536  ;;  %p814_p3 = scmp.lt.s32.totalorder %s980_s25, %s1337_s0 }
  0x18   : > { %p811_p1 = pnand %p810_p0, %p809_p13  ;;  %p815_p4 = scmp.lt.s32.totalorder %s813_s4, %s808_s30 }
  0x1a   : > { %p812_p2 = pneg %p811_p1  ;;  %p816_p5 = por %p815_p4, %p814_p3 }
  0x1c   : > { %p817_p7 = pnand %p816_p5, %p812_p2 }
  0x1e   : > { %820 = shalt.err (!%p817_p7)
}
  0x1f   : > { %s821_s13 = scalar_lea.vmem %s988_s27, 16384  ;;  %s902_s14 = smov [#allocation2]  }
  0x20   : > { %p822_p8 = scmp.ne.s32.totalorder %s988_s27, %s821_s13  ;;  %s826_s16 = sshll.u32 %s902_s14, 4  ;;  %s827_s16 = int_to_ptr.vmem [resolvable:$false] %s826_s16 }
  0x21   : > { %s828_s20 = scalar_lea.vmem %s827_s16, 32768  ;;  %p829_p1 = scmp.lt.s32.totalorder %s988_s27, %s827_s16 }
  0x22   : > { %p824_p9 = pnand %p822_p8, %p810_p0  ;;  %p830_p11 = scmp.lt.s32.totalorder %s828_s20, %s821_s13 }
  0x24   : > { %p825_p13 = pneg %p824_p9  ;;  %p831_p10 = por %p830_p11, %p829_p1 }
  0x26   : > { %p832_p6 = pnand %p831_p10, %p825_p13 }
  0x28   : > { %835 = shalt.err (!%p832_p6)
}
  0x29   : > { %s903_s21 = smov 4096   ;;  %s904_s22 = smov 256  }
  0x2a   : > { %765 = dma.hbm_to_vmem [thread:$0]  (!%p984_p12), %s980_s25, 16384, %s988_s27, %s990_s29, %s903_s21, %s903_s21, %s904_s22  }
  0x2b   : > { %p745_p0 = scmp.ge.s32.totalorder %s900_s9, 1  ;;  %p107_p2 = scmp.lt.s32.totalorder %s900_s9, 5 }
  0x2d   : > { %p108_p3 = pnand %p745_p0, %p107_p2 }
  0x2e   : > { %s1014_s23 = sand.u32 (!%p108_p3), 1, %s892_s7   ;;  %p1346_p6 = scmp.ne.s32.totalorder (!%p108_p3), %s1342_s17, 0 }
  0x2f   : > { %111 = sbr.rel (%p108_p3) target bundleno = 160 (0xa0), region = 24  ;;  %s746_s24 = sshll.u32 (!%p108_p3), %s1014_s23, 10 }
  0x30   : > { %s114_s26 = scalar_lea.sflag (!%p108_p3), [#allocation3], %s1014_s23  ;;  %s1020_s30 = scalar_lea.vmem (!%p108_p3), [#allocation2], %s746_s24 }
  0x34   : > { %879 = dma.done.wait (%p1346_p6), %s114_s26, 16384  }
  0x35   : > { %881 = vsyncadd (%p1346_p6), %s114_s26, 4294950912  ;;  %v138_v0 = vld [vmem:[%s1020_s30] sm:$0xff]  ;;  %v139_v1 = vld [vmem:[%s1020_s30 + $0x8] sm:$0xff]  ;;  %s757_s25 = sshll.u32 %s939_s10, 14  ;;  %s1042_s17 = scalar_lea.vmem [#allocation5], %s746_s24 }
  0x36   : > { %v140_v2 = vld [vmem:[%s1020_s30 + $0x10] sm:$0xff]  ;;  %v266_v3 = vmax.f32 %v138_v0, 0.0  ;;  %v267_v4 = vmax.f32 %v139_v1, 0.0  ;;  %v141_v6 = vld [vmem:[%s1020_s30 + $0x18] sm:$0xff]  ;;  %v142_v7 = vld [vmem:[%s1020_s30 + $0x20] sm:$0xff]  ;;  %s665_s27 = sshll.u32 %s1042_s17, 4  ;;  %s1288_s2 = scalar_lea.hbm %s1338_s1, %s757_s25  ;;  %s1290_s27 = int_to_ptr.vmem [resolvable:$true] %s665_s27 }
  0x37   : > { %v268_v5 = vmax.f32 %v140_v2, 0.0  ;;  %v143_v8 = vld [vmem:[%s1020_s30 + $0x28] sm:$0xff]  ;;  %v269_v9 = vmax.f32 %v141_v6, 0.0  ;;  %v270_v10 = vmax.f32 %v142_v7, 0.0  ;;  %v144_v12 = vld [vmem:[%s1020_s30 + $0x30] sm:$0xff]  ;;  %v145_v13 = vld [vmem:[%s1020_s30 + $0x38] sm:$0xff] }
  0x38   : > { %v271_v11 = vmax.f32 %v143_v8, 0.0  ;;  %v146_v14 = vld [vmem:[%s1020_s30 + $0x40] sm:$0xff]  ;;  %v394_v15 = vmin.f32 %v266_v3, 500.0  ;;  %v395_v16 = vmin.f32 %v267_v4, 500.0  ;;  %v272_v18 = vmax.f32 %v144_v12, 0.0  ;;  %v147_v19 = vld [vmem:[%s1020_s30 + $0x48] sm:$0xff] }
  0x39   : > { %v396_v17 = vmin.f32 %v268_v5, 500.0  ;;  %v148_v20 = vld [vmem:[%s1020_s30 + $0x50] sm:$0xff]  ;;  %v397_v21 = vmin.f32 %v269_v9, 500.0  ;;  %v398_v22 = vmin.f32 %v270_v10, 500.0  ;;  %v273_v24 = vmax.f32 %v145_v13, 0.0  ;;  %v149_v25 = vld [vmem:[%s1020_s30 + $0x58] sm:$0xff] }
  0x3a   : > { %v399_v23 = vmin.f32 %v271_v11, 500.0  ;;  %v150_v26 = vld [vmem:[%s1020_s30 + $0x60] sm:$0xff]  ;;  %522 = vst [vmem:[%s1042_s17] sm:$0xff] %v394_v15  ;;  %523 = vst [vmem:[%s1042_s17 + $0x8] sm:$0xff] %v395_v16  ;;  %v400_v27 = vmin.f32 %v272_v18, 500.0  ;;  %v274_v28 = vmax.f32 %v146_v14, 0.0  ;;  %v275_v29 = vmax.f32 %v147_v19, 0.0 }
  0x3b   : > { %524 = vst [vmem:[%s1042_s17 + $0x10] sm:$0xff] %v396_v17  ;;  %v276_v30 = vmax.f32 %v148_v20, 0.0  ;;  %v151_v31 = vld [vmem:[%s1020_s30 + $0x68] sm:$0xff]  ;;  %v152_v32 = vld [vmem:[%s1020_s30 + $0x70] sm:$0xff]  ;;  %525 = vst [vmem:[%s1042_s17 + $0x18] sm:$0xff] %v397_v21  ;;  %v401_v33 = vmin.f32 %v273_v24, 500.0 }
  0x3c   : > { %526 = vst [vmem:[%s1042_s17 + $0x20] sm:$0xff] %v398_v22  ;;  %527 = vst [vmem:[%s1042_s17 + $0x28] sm:$0xff] %v399_v23  ;;  %v277_v34 = vmax.f32 %v149_v25, 0.0  ;;  %v278_v35 = vmax.f32 %v150_v26, 0.0  ;;  %v279_v36 = vmax.f32 %v151_v31, 0.0  ;;  %v153_v37 = vld [vmem:[%s1020_s30 + $0x78] sm:$0xff] }
  0x3d   : > { %v154_v38 = vld [vmem:[%s1020_s30 + $0x80] sm:$0xff]  ;;  %528 = vst [vmem:[%s1042_s17 + $0x30] sm:$0xff] %v400_v27  ;;  %v402_v39 = vmin.f32 %v274_v28, 500.0  ;;  %v403_v40 = vmin.f32 %v275_v29, 500.0  ;;  %v404_v41 = vmin.f32 %v276_v30, 500.0  ;;  %v280_v42 = vmax.f32 %v152_v32, 0.0 }
  0x3e   : > { %v155_v43 = vld [vmem:[%s1020_s30 + $0x88] sm:$0xff]  ;;  %v156_v44 = vld [vmem:[%s1020_s30 + $0x90] sm:$0xff]  ;;  %529 = vst [vmem:[%s1042_s17 + $0x38] sm:$0xff] %v401_v33  ;;  %v405_v45 = vmin.f32 %v277_v34, 500.0  ;;  %v406_v46 = vmin.f32 %v278_v35, 500.0  ;;  %v407_v47 = vmin.f32 %v279_v36, 500.0 }
  0x3f   : > { %v281_v48 = vmax.f32 %v153_v37, 0.0  ;;  %v157_v49 = vld [vmem:[%s1020_s30 + $0x98] sm:$0xff]  ;;  %v158_v50 = vld [vmem:[%s1020_s30 + $0xa0] sm:$0xff]  ;;  %530 = vst [vmem:[%s1042_s17 + $0x40] sm:$0xff] %v402_v39  ;;  %531 = vst [vmem:[%s1042_s17 + $0x48] sm:$0xff] %v403_v40  ;;  %v408_v51 = vmin.f32 %v280_v42, 500.0 }
  0x40   : > { %532 = vst [vmem:[%s1042_s17 + $0x50] sm:$0xff] %v404_v41  ;;  %v282_v52 = vmax.f32 %v154_v38, 0.0  ;;  %v283_v53 = vmax.f32 %v155_v43, 0.0  ;;  %v284_v54 = vmax.f32 %v156_v44, 0.0  ;;  %v159_v55 = vld [vmem:[%s1020_s30 + $0xa8] sm:$0xff]  ;;  %v160_v56 = vld [vmem:[%s1020_s30 + $0xb0] sm:$0xff] }
  0x41   : > { %533 = vst [vmem:[%s1042_s17 + $0x58] sm:$0xff] %v405_v45  ;;  %534 = vst [vmem:[%s1042_s17 + $0x60] sm:$0xff] %v406_v46  ;;  %v409_v57 = vmin.f32 %v281_v48, 500.0  ;;  %v285_v58 = vmax.f32 %v157_v49, 0.0  ;;  %v286_v59 = vmax.f32 %v158_v50, 0.0  ;;  %v287_v60 = vmax.f32 %v159_v55, 0.0 }
  0x42   : > { %535 = vst [vmem:[%s1042_s17 + $0x68] sm:$0xff] %v407_v47  ;;  %v161_v61 = vld [vmem:[%s1020_s30 + $0xb8] sm:$0xff]  ;;  %v162_v62 = vld [vmem:[%s1020_s30 + $0xc0] sm:$0xff]  ;;  %536 = vst [vmem:[%s1042_s17 + $0x70] sm:$0xff] %v408_v51  ;;  %v410_v63 = vmin.f32 %v282_v52, 500.0  ;;  %v411_v0 = vmin.f32 %v283_v53, 500.0 }
  0x43   : > { %v412_v1 = vmin.f32 %v284_v54, 500.0  ;;  %v288_v2 = vmax.f32 %v160_v56, 0.0  ;;  %v163_v3 = vld [vmem:[%s1020_s30 + $0xc8] sm:$0xff]  ;;  %v164_v4 = vld [vmem:[%s1020_s30 + $0xd0] sm:$0xff]  ;;  %537 = vst [vmem:[%s1042_s17 + $0x78] sm:$0xff] %v409_v57  ;;  %v413_v5 = vmin.f32 %v285_v58, 500.0 }
  0x44   : > { %v414_v6 = vmin.f32 %v286_v59, 500.0  ;;  %v415_v7 = vmin.f32 %v287_v60, 500.0  ;;  %v289_v8 = vmax.f32 %v161_v61, 0.0  ;;  %v165_v9 = vld [vmem:[%s1020_s30 + $0xd8] sm:$0xff]  ;;  %v166_v10 = vld [vmem:[%s1020_s30 + $0xe0] sm:$0xff]  ;;  %538 = vst [vmem:[%s1042_s17 + $0x80] sm:$0xff] %v410_v63 }
  0x45   : > { %539 = vst [vmem:[%s1042_s17 + $0x88] sm:$0xff] %v411_v0  ;;  %540 = vst [vmem:[%s1042_s17 + $0x90] sm:$0xff] %v412_v1  ;;  %v416_v11 = vmin.f32 %v288_v2, 500.0  ;;  %v290_v12 = vmax.f32 %v162_v62, 0.0  ;;  %v291_v13 = vmax.f32 %v163_v3, 0.0  ;;  %v292_v14 = vmax.f32 %v164_v4, 0.0 }
  0x46   : > { %v167_v15 = vld [vmem:[%s1020_s30 + $0xe8] sm:$0xff]  ;;  %v168_v16 = vld [vmem:[%s1020_s30 + $0xf0] sm:$0xff]  ;;  %541 = vst [vmem:[%s1042_s17 + $0x98] sm:$0xff] %v413_v5  ;;  %542 = vst [vmem:[%s1042_s17 + $0xa0] sm:$0xff] %v414_v6  ;;  %v417_v17 = vmin.f32 %v289_v8, 500.0  ;;  %v293_v18 = vmax.f32 %v165_v9, 0.0 }
  0x47   : > { %543 = vst [vmem:[%s1042_s17 + $0xa8] sm:$0xff] %v415_v7  ;;  %v294_v19 = vmax.f32 %v166_v10, 0.0  ;;  %v295_v20 = vmax.f32 %v167_v15, 0.0  ;;  %v169_v21 = vld [vmem:[%s1020_s30 + $0xf8] sm:$0xff]  ;;  %v170_v22 = vld [vmem:[%s1020_s30 + $0x100] sm:$0xff]  ;;  %544 = vst [vmem:[%s1042_s17 + $0xb0] sm:$0xff] %v416_v11 }
  0x48   : > { %v418_v23 = vmin.f32 %v290_v12, 500.0  ;;  %v419_v24 = vmin.f32 %v291_v13, 500.0  ;;  %v420_v25 = vmin.f32 %v292_v14, 500.0  ;;  %v296_v26 = vmax.f32 %v168_v16, 0.0  ;;  %v171_v27 = vld [vmem:[%s1020_s30 + $0x108] sm:$0xff]  ;;  %v172_v28 = vld [vmem:[%s1020_s30 + $0x110] sm:$0xff] }
  0x49   : > { %545 = vst [vmem:[%s1042_s17 + $0xb8] sm:$0xff] %v417_v17  ;;  %v421_v29 = vmin.f32 %v293_v18, 500.0  ;;  %v422_v30 = vmin.f32 %v294_v19, 500.0  ;;  %v423_v31 = vmin.f32 %v295_v20, 500.0  ;;  %v297_v32 = vmax.f32 %v169_v21, 0.0  ;;  %v173_v33 = vld [vmem:[%s1020_s30 + $0x118] sm:$0xff] }
  0x4a   : > { %v174_v34 = vld [vmem:[%s1020_s30 + $0x120] sm:$0xff]  ;;  %546 = vst [vmem:[%s1042_s17 + $0xc0] sm:$0xff] %v418_v23  ;;  %547 = vst [vmem:[%s1042_s17 + $0xc8] sm:$0xff] %v419_v24  ;;  %v424_v35 = vmin.f32 %v296_v26, 500.0  ;;  %v298_v36 = vmax.f32 %v170_v22, 0.0  ;;  %v299_v37 = vmax.f32 %v171_v27, 0.0 }
  0x4b   : > { %548 = vst [vmem:[%s1042_s17 + $0xd0] sm:$0xff] %v420_v25  ;;  %v300_v38 = vmax.f32 %v172_v28, 0.0  ;;  %v175_v39 = vld [vmem:[%s1020_s30 + $0x128] sm:$0xff]  ;;  %v176_v40 = vld [vmem:[%s1020_s30 + $0x130] sm:$0xff]  ;;  %549 = vst [vmem:[%s1042_s17 + $0xd8] sm:$0xff] %v421_v29  ;;  %v425_v41 = vmin.f32 %v297_v32, 500.0 }
  0x4c   : > { %550 = vst [vmem:[%s1042_s17 + $0xe0] sm:$0xff] %v422_v30  ;;  %551 = vst [vmem:[%s1042_s17 + $0xe8] sm:$0xff] %v423_v31  ;;  %v301_v42 = vmax.f32 %v173_v33, 0.0  ;;  %v302_v43 = vmax.f32 %v174_v34, 0.0  ;;  %v303_v44 = vmax.f32 %v175_v39, 0.0  ;;  %v177_v45 = vld [vmem:[%s1020_s30 + $0x138] sm:$0xff] }
  0x4d   : > { %v178_v46 = vld [vmem:[%s1020_s30 + $0x140] sm:$0xff]  ;;  %552 = vst [vmem:[%s1042_s17 + $0xf0] sm:$0xff] %v424_v35  ;;  %v426_v47 = vmin.f32 %v298_v36, 500.0  ;;  %v427_v48 = vmin.f32 %v299_v37, 500.0  ;;  %v428_v49 = vmin.f32 %v300_v38, 500.0  ;;  %v304_v50 = vmax.f32 %v176_v40, 0.0 }
  0x4e   : > { %v179_v51 = vld [vmem:[%s1020_s30 + $0x148] sm:$0xff]  ;;  %v180_v52 = vld [vmem:[%s1020_s30 + $0x150] sm:$0xff]  ;;  %553 = vst [vmem:[%s1042_s17 + $0xf8] sm:$0xff] %v425_v41  ;;  %v429_v53 = vmin.f32 %v301_v42, 500.0  ;;  %v430_v54 = vmin.f32 %v302_v43, 500.0  ;;  %v431_v55 = vmin.f32 %v303_v44, 500.0 }
  0x4f   : > { %v305_v56 = vmax.f32 %v177_v45, 0.0  ;;  %v181_v57 = vld [vmem:[%s1020_s30 + $0x158] sm:$0xff]  ;;  %v182_v58 = vld [vmem:[%s1020_s30 + $0x160] sm:$0xff]  ;;  %554 = vst [vmem:[%s1042_s17 + $0x100] sm:$0xff] %v426_v47  ;;  %555 = vst [vmem:[%s1042_s17 + $0x108] sm:$0xff] %v427_v48  ;;  %v432_v59 = vmin.f32 %v304_v50, 500.0 }
  0x50   : > { %556 = vst [vmem:[%s1042_s17 + $0x110] sm:$0xff] %v428_v49  ;;  %v306_v60 = vmax.f32 %v178_v46, 0.0  ;;  %v307_v61 = vmax.f32 %v179_v51, 0.0  ;;  %v308_v62 = vmax.f32 %v180_v52, 0.0  ;;  %v183_v63 = vld [vmem:[%s1020_s30 + $0x168] sm:$0xff]  ;;  %v184_v0 = vld [vmem:[%s1020_s30 + $0x170] sm:$0xff] }
  0x51   : > { %557 = vst [vmem:[%s1042_s17 + $0x118] sm:$0xff] %v429_v53  ;;  %558 = vst [vmem:[%s1042_s17 + $0x120] sm:$0xff] %v430_v54  ;;  %v433_v1 = vmin.f32 %v305_v56, 500.0  ;;  %v309_v2 = vmax.f32 %v181_v57, 0.0  ;;  %v310_v3 = vmax.f32 %v182_v58, 0.0  ;;  %v311_v4 = vmax.f32 %v183_v63, 0.0 }
  0x52   : > { %559 = vst [vmem:[%s1042_s17 + $0x128] sm:$0xff] %v431_v55  ;;  %v185_v5 = vld [vmem:[%s1020_s30 + $0x178] sm:$0xff]  ;;  %v186_v6 = vld [vmem:[%s1020_s30 + $0x180] sm:$0xff]  ;;  %560 = vst [vmem:[%s1042_s17 + $0x130] sm:$0xff] %v432_v59  ;;  %v434_v7 = vmin.f32 %v306_v60, 500.0  ;;  %v435_v8 = vmin.f32 %v307_v61, 500.0 }
  0x53   : > { %v436_v9 = vmin.f32 %v308_v62, 500.0  ;;  %v312_v10 = vmax.f32 %v184_v0, 0.0  ;;  %v187_v11 = vld [vmem:[%s1020_s30 + $0x188] sm:$0xff]  ;;  %v188_v12 = vld [vmem:[%s1020_s30 + $0x190] sm:$0xff]  ;;  %561 = vst [vmem:[%s1042_s17 + $0x138] sm:$0xff] %v433_v1  ;;  %v437_v13 = vmin.f32 %v309_v2, 500.0 }
  0x54   : > { %v438_v14 = vmin.f32 %v310_v3, 500.0  ;;  %v439_v15 = vmin.f32 %v311_v4, 500.0  ;;  %v313_v16 = vmax.f32 %v185_v5, 0.0  ;;  %v189_v17 = vld [vmem:[%s1020_s30 + $0x198] sm:$0xff]  ;;  %v190_v18 = vld [vmem:[%s1020_s30 + $0x1a0] sm:$0xff]  ;;  %562 = vst [vmem:[%s1042_s17 + $0x140] sm:$0xff] %v434_v7 }
  0x55   : > { %563 = vst [vmem:[%s1042_s17 + $0x148] sm:$0xff] %v435_v8  ;;  %564 = vst [vmem:[%s1042_s17 + $0x150] sm:$0xff] %v436_v9  ;;  %v440_v19 = vmin.f32 %v312_v10, 500.0  ;;  %v314_v20 = vmax.f32 %v186_v6, 0.0  ;;  %v315_v21 = vmax.f32 %v187_v11, 0.0  ;;  %v316_v22 = vmax.f32 %v188_v12, 0.0 }
  0x56   : > { %v191_v23 = vld [vmem:[%s1020_s30 + $0x1a8] sm:$0xff]  ;;  %v192_v24 = vld [vmem:[%s1020_s30 + $0x1b0] sm:$0xff]  ;;  %565 = vst [vmem:[%s1042_s17 + $0x158] sm:$0xff] %v437_v13  ;;  %566 = vst [vmem:[%s1042_s17 + $0x160] sm:$0xff] %v438_v14  ;;  %v441_v25 = vmin.f32 %v313_v16, 500.0  ;;  %v317_v26 = vmax.f32 %v189_v17, 0.0 }
  0x57   : > { %567 = vst [vmem:[%s1042_s17 + $0x168] sm:$0xff] %v439_v15  ;;  %v318_v27 = vmax.f32 %v190_v18, 0.0  ;;  %v319_v28 = vmax.f32 %v191_v23, 0.0  ;;  %v193_v29 = vld [vmem:[%s1020_s30 + $0x1b8] sm:$0xff]  ;;  %v194_v30 = vld [vmem:[%s1020_s30 + $0x1c0] sm:$0xff]  ;;  %568 = vst [vmem:[%s1042_s17 + $0x170] sm:$0xff] %v440_v19 }
  0x58   : > { %v442_v31 = vmin.f32 %v314_v20, 500.0  ;;  %v443_v32 = vmin.f32 %v315_v21, 500.0  ;;  %v444_v33 = vmin.f32 %v316_v22, 500.0  ;;  %v320_v34 = vmax.f32 %v192_v24, 0.0  ;;  %v195_v35 = vld [vmem:[%s1020_s30 + $0x1c8] sm:$0xff]  ;;  %v196_v36 = vld [vmem:[%s1020_s30 + $0x1d0] sm:$0xff] }
  0x59   : > { %569 = vst [vmem:[%s1042_s17 + $0x178] sm:$0xff] %v441_v25  ;;  %v445_v37 = vmin.f32 %v317_v26, 500.0  ;;  %v446_v38 = vmin.f32 %v318_v27, 500.0  ;;  %v447_v39 = vmin.f32 %v319_v28, 500.0  ;;  %v321_v40 = vmax.f32 %v193_v29, 0.0  ;;  %v197_v41 = vld [vmem:[%s1020_s30 + $0x1d8] sm:$0xff] }
  0x5a   : > { %v198_v42 = vld [vmem:[%s1020_s30 + $0x1e0] sm:$0xff]  ;;  %570 = vst [vmem:[%s1042_s17 + $0x180] sm:$0xff] %v442_v31  ;;  %571 = vst [vmem:[%s1042_s17 + $0x188] sm:$0xff] %v443_v32  ;;  %v448_v43 = vmin.f32 %v320_v34, 500.0  ;;  %v322_v44 = vmax.f32 %v194_v30, 0.0  ;;  %v323_v45 = vmax.f32 %v195_v35, 0.0 }
  0x5b   : > { %572 = vst [vmem:[%s1042_s17 + $0x190] sm:$0xff] %v444_v33  ;;  %v324_v46 = vmax.f32 %v196_v36, 0.0  ;;  %v199_v47 = vld [vmem:[%s1020_s30 + $0x1e8] sm:$0xff]  ;;  %v200_v48 = vld [vmem:[%s1020_s30 + $0x1f0] sm:$0xff]  ;;  %573 = vst [vmem:[%s1042_s17 + $0x198] sm:$0xff] %v445_v37  ;;  %v449_v49 = vmin.f32 %v321_v40, 500.0 }
  0x5c   : > { %574 = vst [vmem:[%s1042_s17 + $0x1a0] sm:$0xff] %v446_v38  ;;  %575 = vst [vmem:[%s1042_s17 + $0x1a8] sm:$0xff] %v447_v39  ;;  %v325_v50 = vmax.f32 %v197_v41, 0.0  ;;  %v326_v51 = vmax.f32 %v198_v42, 0.0  ;;  %v327_v52 = vmax.f32 %v199_v47, 0.0  ;;  %v201_v53 = vld [vmem:[%s1020_s30 + $0x1f8] sm:$0xff] }
  0x5d   : > { %v202_v54 = vld [vmem:[%s1020_s30 + $0x200] sm:$0xff]  ;;  %576 = vst [vmem:[%s1042_s17 + $0x1b0] sm:$0xff] %v448_v43  ;;  %v450_v55 = vmin.f32 %v322_v44, 500.0  ;;  %v451_v56 = vmin.f32 %v323_v45, 500.0  ;;  %v452_v57 = vmin.f32 %v324_v46, 500.0  ;;  %v328_v58 = vmax.f32 %v200_v48, 0.0 }
  0x5e   : > { %v203_v59 = vld [vmem:[%s1020_s30 + $0x208] sm:$0xff]  ;;  %v204_v60 = vld [vmem:[%s1020_s30 + $0x210] sm:$0xff]  ;;  %577 = vst [vmem:[%s1042_s17 + $0x1b8] sm:$0xff] %v449_v49  ;;  %v453_v61 = vmin.f32 %v325_v50, 500.0  ;;  %v454_v62 = vmin.f32 %v326_v51, 500.0  ;;  %v455_v63 = vmin.f32 %v327_v52, 500.0 }
  0x5f   : > { %v329_v0 = vmax.f32 %v201_v53, 0.0  ;;  %v205_v1 = vld [vmem:[%s1020_s30 + $0x218] sm:$0xff]  ;;  %v206_v2 = vld [vmem:[%s1020_s30 + $0x220] sm:$0xff]  ;;  %578 = vst [vmem:[%s1042_s17 + $0x1c0] sm:$0xff] %v450_v55  ;;  %579 = vst [vmem:[%s1042_s17 + $0x1c8] sm:$0xff] %v451_v56  ;;  %v456_v3 = vmin.f32 %v328_v58, 500.0 }
  0x60   : > { %580 = vst [vmem:[%s1042_s17 + $0x1d0] sm:$0xff] %v452_v57  ;;  %v330_v4 = vmax.f32 %v202_v54, 0.0  ;;  %v331_v5 = vmax.f32 %v203_v59, 0.0  ;;  %v332_v6 = vmax.f32 %v204_v60, 0.0  ;;  %v207_v7 = vld [vmem:[%s1020_s30 + $0x228] sm:$0xff]  ;;  %v208_v8 = vld [vmem:[%s1020_s30 + $0x230] sm:$0xff] }
  0x61   : > { %581 = vst [vmem:[%s1042_s17 + $0x1d8] sm:$0xff] %v453_v61  ;;  %582 = vst [vmem:[%s1042_s17 + $0x1e0] sm:$0xff] %v454_v62  ;;  %v457_v9 = vmin.f32 %v329_v0, 500.0  ;;  %v333_v10 = vmax.f32 %v205_v1, 0.0  ;;  %v334_v11 = vmax.f32 %v206_v2, 0.0  ;;  %v335_v12 = vmax.f32 %v207_v7, 0.0 }
  0x62   : > { %583 = vst [vmem:[%s1042_s17 + $0x1e8] sm:$0xff] %v455_v63  ;;  %v209_v13 = vld [vmem:[%s1020_s30 + $0x238] sm:$0xff]  ;;  %v210_v14 = vld [vmem:[%s1020_s30 + $0x240] sm:$0xff]  ;;  %584 = vst [vmem:[%s1042_s17 + $0x1f0] sm:$0xff] %v456_v3  ;;  %v458_v15 = vmin.f32 %v330_v4, 500.0  ;;  %v459_v16 = vmin.f32 %v331_v5, 500.0 }
  0x63   : > { %v460_v17 = vmin.f32 %v332_v6, 500.0  ;;  %v336_v18 = vmax.f32 %v208_v8, 0.0  ;;  %v211_v19 = vld [vmem:[%s1020_s30 + $0x248] sm:$0xff]  ;;  %v212_v20 = vld [vmem:[%s1020_s30 + $0x250] sm:$0xff]  ;;  %585 = vst [vmem:[%s1042_s17 + $0x1f8] sm:$0xff] %v457_v9  ;;  %v461_v21 = vmin.f32 %v333_v10, 500.0 }
  0x64   : > { %v462_v22 = vmin.f32 %v334_v11, 500.0  ;;  %v463_v23 = vmin.f32 %v335_v12, 500.0  ;;  %v337_v24 = vmax.f32 %v209_v13, 0.0  ;;  %v213_v25 = vld [vmem:[%s1020_s30 + $0x258] sm:$0xff]  ;;  %v214_v26 = vld [vmem:[%s1020_s30 + $0x260] sm:$0xff]  ;;  %586 = vst [vmem:[%s1042_s17 + $0x200] sm:$0xff] %v458_v15 }
  0x65   : > { %587 = vst [vmem:[%s1042_s17 + $0x208] sm:$0xff] %v459_v16  ;;  %588 = vst [vmem:[%s1042_s17 + $0x210] sm:$0xff] %v460_v17  ;;  %v464_v27 = vmin.f32 %v336_v18, 500.0  ;;  %v338_v28 = vmax.f32 %v210_v14, 0.0  ;;  %v339_v29 = vmax.f32 %v211_v19, 0.0  ;;  %v340_v30 = vmax.f32 %v212_v20, 0.0 }
  0x66   : > { %v215_v31 = vld [vmem:[%s1020_s30 + $0x268] sm:$0xff]  ;;  %v216_v32 = vld [vmem:[%s1020_s30 + $0x270] sm:$0xff]  ;;  %589 = vst [vmem:[%s1042_s17 + $0x218] sm:$0xff] %v461_v21  ;;  %590 = vst [vmem:[%s1042_s17 + $0x220] sm:$0xff] %v462_v22  ;;  %v465_v33 = vmin.f32 %v337_v24, 500.0  ;;  %v341_v34 = vmax.f32 %v213_v25, 0.0 }
  0x67   : > { %591 = vst [vmem:[%s1042_s17 + $0x228] sm:$0xff] %v463_v23  ;;  %v342_v35 = vmax.f32 %v214_v26, 0.0  ;;  %v343_v36 = vmax.f32 %v215_v31, 0.0  ;;  %v217_v37 = vld [vmem:[%s1020_s30 + $0x278] sm:$0xff]  ;;  %v218_v38 = vld [vmem:[%s1020_s30 + $0x280] sm:$0xff]  ;;  %592 = vst [vmem:[%s1042_s17 + $0x230] sm:$0xff] %v464_v27 }
  0x68   : > { %v466_v39 = vmin.f32 %v338_v28, 500.0  ;;  %v467_v40 = vmin.f32 %v339_v29, 500.0  ;;  %v468_v41 = vmin.f32 %v340_v30, 500.0  ;;  %v344_v42 = vmax.f32 %v216_v32, 0.0  ;;  %v219_v43 = vld [vmem:[%s1020_s30 + $0x288] sm:$0xff]  ;;  %v220_v44 = vld [vmem:[%s1020_s30 + $0x290] sm:$0xff] }
  0x69   : > { %593 = vst [vmem:[%s1042_s17 + $0x238] sm:$0xff] %v465_v33  ;;  %v469_v45 = vmin.f32 %v341_v34, 500.0  ;;  %v470_v46 = vmin.f32 %v342_v35, 500.0  ;;  %v471_v47 = vmin.f32 %v343_v36, 500.0  ;;  %v345_v48 = vmax.f32 %v217_v37, 0.0  ;;  %v221_v49 = vld [vmem:[%s1020_s30 + $0x298] sm:$0xff] }
  0x6a   : > { %v222_v50 = vld [vmem:[%s1020_s30 + $0x2a0] sm:$0xff]  ;;  %594 = vst [vmem:[%s1042_s17 + $0x240] sm:$0xff] %v466_v39  ;;  %595 = vst [vmem:[%s1042_s17 + $0x248] sm:$0xff] %v467_v40  ;;  %v472_v51 = vmin.f32 %v344_v42, 500.0  ;;  %v346_v52 = vmax.f32 %v218_v38, 0.0  ;;  %v347_v53 = vmax.f32 %v219_v43, 0.0 }
  0x6b   : > { %596 = vst [vmem:[%s1042_s17 + $0x250] sm:$0xff] %v468_v41  ;;  %v348_v54 = vmax.f32 %v220_v44, 0.0  ;;  %v223_v55 = vld [vmem:[%s1020_s30 + $0x2a8] sm:$0xff]  ;;  %v224_v56 = vld [vmem:[%s1020_s30 + $0x2b0] sm:$0xff]  ;;  %597 = vst [vmem:[%s1042_s17 + $0x258] sm:$0xff] %v469_v45  ;;  %v473_v57 = vmin.f32 %v345_v48, 500.0 }
  0x6c   : > { %598 = vst [vmem:[%s1042_s17 + $0x260] sm:$0xff] %v470_v46  ;;  %599 = vst [vmem:[%s1042_s17 + $0x268] sm:$0xff] %v471_v47  ;;  %v349_v58 = vmax.f32 %v221_v49, 0.0  ;;  %v350_v59 = vmax.f32 %v222_v50, 0.0  ;;  %v351_v60 = vmax.f32 %v223_v55, 0.0  ;;  %v225_v61 = vld [vmem:[%s1020_s30 + $0x2b8] sm:$0xff] }
  0x6d   : > { %v226_v62 = vld [vmem:[%s1020_s30 + $0x2c0] sm:$0xff]  ;;  %600 = vst [vmem:[%s1042_s17 + $0x270] sm:$0xff] %v472_v51  ;;  %v474_v63 = vmin.f32 %v346_v52, 500.0  ;;  %v475_v0 = vmin.f32 %v347_v53, 500.0  ;;  %v476_v1 = vmin.f32 %v348_v54, 500.0  ;;  %v352_v2 = vmax.f32 %v224_v56, 0.0 }
  0x6e   : > { %v227_v3 = vld [vmem:[%s1020_s30 + $0x2c8] sm:$0xff]  ;;  %v228_v4 = vld [vmem:[%s1020_s30 + $0x2d0] sm:$0xff]  ;;  %601 = vst [vmem:[%s1042_s17 + $0x278] sm:$0xff] %v473_v57  ;;  %v477_v5 = vmin.f32 %v349_v58, 500.0  ;;  %v478_v6 = vmin.f32 %v350_v59, 500.0  ;;  %v479_v7 = vmin.f32 %v351_v60, 500.0 }
  0x6f   : > { %v353_v8 = vmax.f32 %v225_v61, 0.0  ;;  %v229_v9 = vld [vmem:[%s1020_s30 + $0x2d8] sm:$0xff]  ;;  %v230_v10 = vld [vmem:[%s1020_s30 + $0x2e0] sm:$0xff]  ;;  %602 = vst [vmem:[%s1042_s17 + $0x280] sm:$0xff] %v474_v63  ;;  %603 = vst [vmem:[%s1042_s17 + $0x288] sm:$0xff] %v475_v0  ;;  %v480_v11 = vmin.f32 %v352_v2, 500.0 }
  0x70   : > { %604 = vst [vmem:[%s1042_s17 + $0x290] sm:$0xff] %v476_v1  ;;  %v354_v12 = vmax.f32 %v226_v62, 0.0  ;;  %v355_v13 = vmax.f32 %v227_v3, 0.0  ;;  %v356_v14 = vmax.f32 %v228_v4, 0.0  ;;  %v231_v15 = vld [vmem:[%s1020_s30 + $0x2e8] sm:$0xff]  ;;  %v232_v16 = vld [vmem:[%s1020_s30 + $0x2f0] sm:$0xff] }
  0x71   : > { %605 = vst [vmem:[%s1042_s17 + $0x298] sm:$0xff] %v477_v5  ;;  %606 = vst [vmem:[%s1042_s17 + $0x2a0] sm:$0xff] %v478_v6  ;;  %v481_v17 = vmin.f32 %v353_v8, 500.0  ;;  %v357_v18 = vmax.f32 %v229_v9, 0.0  ;;  %v358_v19 = vmax.f32 %v230_v10, 0.0  ;;  %v359_v20 = vmax.f32 %v231_v15, 0.0 }
  0x72   : > { %607 = vst [vmem:[%s1042_s17 + $0x2a8] sm:$0xff] %v479_v7  ;;  %v233_v21 = vld [vmem:[%s1020_s30 + $0x2f8] sm:$0xff]  ;;  %v234_v22 = vld [vmem:[%s1020_s30 + $0x300] sm:$0xff]  ;;  %608 = vst [vmem:[%s1042_s17 + $0x2b0] sm:$0xff] %v480_v11  ;;  %v482_v23 = vmin.f32 %v354_v12, 500.0  ;;  %v483_v24 = vmin.f32 %v355_v13, 500.0 }
  0x73   : > { %v484_v25 = vmin.f32 %v356_v14, 500.0  ;;  %v360_v26 = vmax.f32 %v232_v16, 0.0  ;;  %v235_v27 = vld [vmem:[%s1020_s30 + $0x308] sm:$0xff]  ;;  %v236_v28 = vld [vmem:[%s1020_s30 + $0x310] sm:$0xff]  ;;  %609 = vst [vmem:[%s1042_s17 + $0x2b8] sm:$0xff] %v481_v17  ;;  %v485_v29 = vmin.f32 %v357_v18, 500.0 }
  0x74   : > { %v486_v30 = vmin.f32 %v358_v19, 500.0  ;;  %v487_v31 = vmin.f32 %v359_v20, 500.0  ;;  %v361_v32 = vmax.f32 %v233_v21, 0.0  ;;  %v237_v33 = vld [vmem:[%s1020_s30 + $0x318] sm:$0xff]  ;;  %v238_v34 = vld [vmem:[%s1020_s30 + $0x320] sm:$0xff]  ;;  %610 = vst [vmem:[%s1042_s17 + $0x2c0] sm:$0xff] %v482_v23 }
  0x75   : > { %611 = vst [vmem:[%s1042_s17 + $0x2c8] sm:$0xff] %v483_v24  ;;  %612 = vst [vmem:[%s1042_s17 + $0x2d0] sm:$0xff] %v484_v25  ;;  %v488_v35 = vmin.f32 %v360_v26, 500.0  ;;  %v362_v36 = vmax.f32 %v234_v22, 0.0  ;;  %v363_v37 = vmax.f32 %v235_v27, 0.0  ;;  %v364_v38 = vmax.f32 %v236_v28, 0.0 }
  0x76   : > { %v239_v39 = vld [vmem:[%s1020_s30 + $0x328] sm:$0xff]  ;;  %v240_v40 = vld [vmem:[%s1020_s30 + $0x330] sm:$0xff]  ;;  %613 = vst [vmem:[%s1042_s17 + $0x2d8] sm:$0xff] %v485_v29  ;;  %614 = vst [vmem:[%s1042_s17 + $0x2e0] sm:$0xff] %v486_v30  ;;  %v489_v41 = vmin.f32 %v361_v32, 500.0  ;;  %v365_v42 = vmax.f32 %v237_v33, 0.0 }
  0x77   : > { %615 = vst [vmem:[%s1042_s17 + $0x2e8] sm:$0xff] %v487_v31  ;;  %v366_v43 = vmax.f32 %v238_v34, 0.0  ;;  %v367_v44 = vmax.f32 %v239_v39, 0.0  ;;  %v241_v45 = vld [vmem:[%s1020_s30 + $0x338] sm:$0xff]  ;;  %v242_v46 = vld [vmem:[%s1020_s30 + $0x340] sm:$0xff]  ;;  %616 = vst [vmem:[%s1042_s17 + $0x2f0] sm:$0xff] %v488_v35 }
  0x78   : > { %v490_v47 = vmin.f32 %v362_v36, 500.0  ;;  %v491_v48 = vmin.f32 %v363_v37, 500.0  ;;  %v492_v49 = vmin.f32 %v364_v38, 500.0  ;;  %v368_v50 = vmax.f32 %v240_v40, 0.0  ;;  %v243_v51 = vld [vmem:[%s1020_s30 + $0x348] sm:$0xff]  ;;  %v244_v52 = vld [vmem:[%s1020_s30 + $0x350] sm:$0xff] }
  0x79   : > { %617 = vst [vmem:[%s1042_s17 + $0x2f8] sm:$0xff] %v489_v41  ;;  %v493_v53 = vmin.f32 %v365_v42, 500.0  ;;  %v494_v54 = vmin.f32 %v366_v43, 500.0  ;;  %v495_v55 = vmin.f32 %v367_v44, 500.0  ;;  %v369_v56 = vmax.f32 %v241_v45, 0.0  ;;  %v245_v57 = vld [vmem:[%s1020_s30 + $0x358] sm:$0xff] }
  0x7a   : > { %v246_v58 = vld [vmem:[%s1020_s30 + $0x360] sm:$0xff]  ;;  %618 = vst [vmem:[%s1042_s17 + $0x300] sm:$0xff] %v490_v47  ;;  %619 = vst [vmem:[%s1042_s17 + $0x308] sm:$0xff] %v491_v48  ;;  %v496_v59 = vmin.f32 %v368_v50, 500.0  ;;  %v370_v60 = vmax.f32 %v242_v46, 0.0  ;;  %v371_v61 = vmax.f32 %v243_v51, 0.0 }
  0x7b   : > { %620 = vst [vmem:[%s1042_s17 + $0x310] sm:$0xff] %v492_v49  ;;  %v372_v62 = vmax.f32 %v244_v52, 0.0  ;;  %v247_v63 = vld [vmem:[%s1020_s30 + $0x368] sm:$0xff]  ;;  %v248_v0 = vld [vmem:[%s1020_s30 + $0x370] sm:$0xff]  ;;  %621 = vst [vmem:[%s1042_s17 + $0x318] sm:$0xff] %v493_v53  ;;  %v497_v1 = vmin.f32 %v369_v56, 500.0 }
  0x7c   : > { %622 = vst [vmem:[%s1042_s17 + $0x320] sm:$0xff] %v494_v54  ;;  %623 = vst [vmem:[%s1042_s17 + $0x328] sm:$0xff] %v495_v55  ;;  %v373_v2 = vmax.f32 %v245_v57, 0.0  ;;  %v374_v3 = vmax.f32 %v246_v58, 0.0  ;;  %v375_v4 = vmax.f32 %v247_v63, 0.0  ;;  %v249_v5 = vld [vmem:[%s1020_s30 + $0x378] sm:$0xff] }
  0x7d   : > { %v250_v6 = vld [vmem:[%s1020_s30 + $0x380] sm:$0xff]  ;;  %624 = vst [vmem:[%s1042_s17 + $0x330] sm:$0xff] %v496_v59  ;;  %v498_v7 = vmin.f32 %v370_v60, 500.0  ;;  %v499_v8 = vmin.f32 %v371_v61, 500.0  ;;  %v500_v9 = vmin.f32 %v372_v62, 500.0  ;;  %v376_v10 = vmax.f32 %v248_v0, 0.0 }
  0x7e   : > { %v251_v11 = vld [vmem:[%s1020_s30 + $0x388] sm:$0xff]  ;;  %v252_v12 = vld [vmem:[%s1020_s30 + $0x390] sm:$0xff]  ;;  %625 = vst [vmem:[%s1042_s17 + $0x338] sm:$0xff] %v497_v1  ;;  %v501_v13 = vmin.f32 %v373_v2, 500.0  ;;  %v502_v14 = vmin.f32 %v374_v3, 500.0  ;;  %v503_v15 = vmin.f32 %v375_v4, 500.0 }
  0x7f   : > { %v377_v16 = vmax.f32 %v249_v5, 0.0  ;;  %v253_v17 = vld [vmem:[%s1020_s30 + $0x398] sm:$0xff]  ;;  %v254_v18 = vld [vmem:[%s1020_s30 + $0x3a0] sm:$0xff]  ;;  %626 = vst [vmem:[%s1042_s17 + $0x340] sm:$0xff] %v498_v7  ;;  %627 = vst [vmem:[%s1042_s17 + $0x348] sm:$0xff] %v499_v8  ;;  %v504_v19 = vmin.f32 %v376_v10, 500.0 }
  0x80   : > { %628 = vst [vmem:[%s1042_s17 + $0x350] sm:$0xff] %v500_v9  ;;  %v378_v20 = vmax.f32 %v250_v6, 0.0  ;;  %v379_v21 = vmax.f32 %v251_v11, 0.0  ;;  %v380_v22 = vmax.f32 %v252_v12, 0.0  ;;  %v255_v23 = vld [vmem:[%s1020_s30 + $0x3a8] sm:$0xff]  ;;  %v256_v24 = vld [vmem:[%s1020_s30 + $0x3b0] sm:$0xff] }
  0x81   : > { %629 = vst [vmem:[%s1042_s17 + $0x358] sm:$0xff] %v501_v13  ;;  %630 = vst [vmem:[%s1042_s17 + $0x360] sm:$0xff] %v502_v14  ;;  %v505_v25 = vmin.f32 %v377_v16, 500.0  ;;  %v381_v26 = vmax.f32 %v253_v17, 0.0  ;;  %v382_v27 = vmax.f32 %v254_v18, 0.0  ;;  %v383_v28 = vmax.f32 %v255_v23, 0.0 }
  0x82   : > { %631 = vst [vmem:[%s1042_s17 + $0x368] sm:$0xff] %v503_v15  ;;  %v257_v29 = vld [vmem:[%s1020_s30 + $0x3b8] sm:$0xff]  ;;  %v258_v30 = vld [vmem:[%s1020_s30 + $0x3c0] sm:$0xff]  ;;  %632 = vst [vmem:[%s1042_s17 + $0x370] sm:$0xff] %v504_v19  ;;  %v506_v31 = vmin.f32 %v378_v20, 500.0  ;;  %v507_v32 = vmin.f32 %v379_v21, 500.0 }
  0x83   : > { %v508_v33 = vmin.f32 %v380_v22, 500.0  ;;  %v384_v34 = vmax.f32 %v256_v24, 0.0  ;;  %v259_v35 = vld [vmem:[%s1020_s30 + $0x3c8] sm:$0xff]  ;;  %v260_v36 = vld [vmem:[%s1020_s30 + $0x3d0] sm:$0xff]  ;;  %633 = vst [vmem:[%s1042_s17 + $0x378] sm:$0xff] %v505_v25  ;;  %v509_v37 = vmin.f32 %v381_v26, 500.0 }
  0x84   : > { %v510_v38 = vmin.f32 %v382_v27, 500.0  ;;  %v511_v39 = vmin.f32 %v383_v28, 500.0  ;;  %v385_v40 = vmax.f32 %v257_v29, 0.0  ;;  %v261_v41 = vld [vmem:[%s1020_s30 + $0x3d8] sm:$0xff]  ;;  %v262_v42 = vld [vmem:[%s1020_s30 + $0x3e0] sm:$0xff]  ;;  %634 = vst [vmem:[%s1042_s17 + $0x380] sm:$0xff] %v506_v31 }
  0x85   : > { %635 = vst [vmem:[%s1042_s17 + $0x388] sm:$0xff] %v507_v32  ;;  %636 = vst [vmem:[%s1042_s17 + $0x390] sm:$0xff] %v508_v33  ;;  %v512_v43 = vmin.f32 %v384_v34, 500.0  ;;  %v386_v44 = vmax.f32 %v258_v30, 0.0  ;;  %v387_v45 = vmax.f32 %v259_v35, 0.0  ;;  %v388_v46 = vmax.f32 %v260_v36, 0.0 }
  0x86   : > { %v263_v47 = vld [vmem:[%s1020_s30 + $0x3e8] sm:$0xff]  ;;  %v264_v48 = vld [vmem:[%s1020_s30 + $0x3f0] sm:$0xff]  ;;  %637 = vst [vmem:[%s1042_s17 + $0x398] sm:$0xff] %v509_v37  ;;  %638 = vst [vmem:[%s1042_s17 + $0x3a0] sm:$0xff] %v510_v38  ;;  %v513_v49 = vmin.f32 %v385_v40, 500.0  ;;  %v389_v50 = vmax.f32 %v261_v41, 0.0 }
  0x87   : > { %639 = vst [vmem:[%s1042_s17 + $0x3a8] sm:$0xff] %v511_v39  ;;  %v390_v51 = vmax.f32 %v262_v42, 0.0  ;;  %v391_v52 = vmax.f32 %v263_v47, 0.0  ;;  %v265_v53 = vld [vmem:[%s1020_s30 + $0x3f8] sm:$0xff]  ;;  %640 = vst [vmem:[%s1042_s17 + $0x3b0] sm:$0xff] %v512_v43  ;;  %v514_v54 = vmin.f32 %v386_v44, 500.0 }
  0x88   : > { %v515_v55 = vmin.f32 %v387_v45, 500.0  ;;  %v516_v56 = vmin.f32 %v388_v46, 500.0  ;;  %v392_v57 = vmax.f32 %v264_v48, 0.0  ;;  %641 = vst [vmem:[%s1042_s17 + $0x3b8] sm:$0xff] %v513_v49  ;;  %v517_v58 = vmin.f32 %v389_v50, 500.0  ;;  %s651_s3 = scalar_lea.sflag [#allocation4], %s1014_s23 }
  0x89   : > { %v518_v59 = vmin.f32 %v390_v51, 500.0  ;;  %v519_v60 = vmin.f32 %v391_v52, 500.0  ;;  %v393_v61 = vmax.f32 %v265_v53, 0.0  ;;  %642 = vst [vmem:[%s1042_s17 + $0x3c0] sm:$0xff] %v514_v54  ;;  %s836_s4 = scalar_lea.vmem %s1290_s27, 16384  ;;  %p1347_p11 = scmp.ne.s32.totalorder %s1343_s18, 0 }
  0x8a   : > { %643 = vst [vmem:[%s1042_s17 + $0x3c8] sm:$0xff] %v515_v55  ;;  %644 = vst [vmem:[%s1042_s17 + $0x3d0] sm:$0xff] %v516_v56  ;;  %v520_v62 = vmin.f32 %v392_v57, 500.0  ;;  %p837_p10 = scmp.ne.s32.totalorder %s1290_s27, %s836_s4  ;;  %s905_s10 = smov [#allocation5]  }
  0x8b   : > { %645 = vst [vmem:[%s1042_s17 + $0x3d8] sm:$0xff] %v517_v58  ;;  %646 = vst [vmem:[%s1042_s17 + $0x3e0] sm:$0xff] %v518_v59  ;;  %v521_v63 = vmin.f32 %v393_v61, 500.0  ;;  %s840_s5 = sshll.u32 %s905_s10, 4  ;;  %s841_s5 = int_to_ptr.vmem [resolvable:$false] %s840_s5 }
  0x8c   : > { %647 = vst [vmem:[%s1042_s17 + $0x3e8] sm:$0xff] %v519_v60  ;;  %648 = vst [vmem:[%s1042_s17 + $0x3f0] sm:$0xff] %v520_v62  ;;  %p838_p12 = pnand %p837_p10, %p1347_p11  ;;  %s842_s11 = scalar_lea.vmem %s841_s5, 32768 }
  0x8d   : > { %649 = vst [vmem:[%s1042_s17 + $0x3f8] sm:$0xff] %v521_v63  ;;  %p843_p5 = scmp.lt.s32.totalorder %s1290_s27, %s841_s5  ;;  %p844_p7 = scmp.lt.s32.totalorder %s842_s11, %s836_s4 }
  0x8e   : > { %p839_p4 = pneg %p838_p12 }
  0x8f   : > { %p845_p8 = por %p844_p7, %p843_p5 }
  0x91   : > { %p846_p9 = pnand %p845_p8, %p839_p4 }
  0x93   : > { %849 = shalt.err (!%p846_p9)
}
  0x94   : > { %s850_s13 = scalar_lea.hbm %s1288_s2, 16384  ;;  %s854_s20 = scalar_lea.hbm %s1338_s1, 65536 }
  0x95   : > { %p851_p13 = scmp.ne.s32.totalorder %s1288_s2, %s850_s13  ;;  %p855_p2 = scmp.lt.s32.totalorder %s1288_s2, %s1338_s1 }
  0x96   : > { %p856_p3 = scmp.lt.s32.totalorder %s854_s20, %s850_s13 }
  0x97   : > { %p852_p1 = pnand %p851_p13, %p1347_p11 }
  0x98   : > { %p857_p6 = por %p856_p3, %p855_p2 }
  0x99   : > { %p853_p0 = pneg %p852_p1 }
  0x9b   : > { %p858_p10 = pnand %p857_p6, %p853_p0 }
  0x9d   : > { %861 = shalt.err (!%p858_p10)
}
  0x9e   : > { %s906_s24 = smov 4096   ;;  %s907_s26 = smov 256  }
  0x9f   : > { %760 = dma.vmem_to_hbm [thread:$0]  (%p1347_p11), %s1290_s27, 16384, %s1288_s2, %s651_s3, %s906_s24, %s906_s24, %s907_s26  }
  0xa0 PF: > { %p771_p12 = scmp.ge.s32.totalorder %s900_s9, 2  ;;  %s680_s30 = sand.u32 1, %s888_s6  }
  0xa1   : > { %p1348_p4 = scmp.ne.s32.totalorder %s1344_s19, 0  ;;  %s681_s25 = scalar_lea.sflag [#allocation4], %s680_s30 }
  0xa3   : > { %p767_p5 = pnand %p771_p12, %p1348_p4 }
  0xa5   : > { %p768_p7 = pneg %p767_p5 }
  0xa7   : > { %883 = dma.done.wait (%p768_p7), %s681_s25, 16384  }
  0xa8   : > { %885 = vsyncadd (%p768_p7), %s681_s25, 4294950912  ;;  %p14_p8 = scmp.ge.s32.totalorder %s943_s12, 6   ;;  %s1349_s6 = smov %s892_s7 }
  0xa9   : > { %s1350_s7 = smov %s896_s8  ;;  %s1351_s8 = smov %s955_s15 }
  0xaa   : > { %s1352_s9 = smov %s943_s12  ;;  %16 = sbr.rel (!%p14_p8) target bundleno = 5 (0x5), region = 69 }
  0xaf   :  { %686 = vsyncpa [#allocation3], 1 }
  0xb0   :  { %688 = vsyncpa [#allocation3 + $0x1], 1 }
  0xb1   :  { %689 = vsyncpa [#allocation4], 1 }
  0xb2   :  { %691 = vsyncpa [#allocation4 + $0x1], 1 }

</bundles_post_ra>
